<compile_context>
chip_gen: v7x
topology: tpu7x:2x2x1
jax: 0.10.0
libtpu: 0.0.40
codegen_flags: <defaults>
</compile_context>

<pallas_src>
import jax
import jax.numpy as jnp
from jax import lax
from jax.experimental import pallas as pl
from jax.experimental.pallas import tpu as pltpu


def _graph_learning_kernel(scal_ref, nb_ref, x_ref, w0_ref, w1_ref, w2_ref, b2_ref,
                           out_ref, acc_ref):
    # scal_ref: SMEM (3,)  f32 = [b0, b1, 1/B]
    # nb_ref:   SMEM (1,)  i32 = [B]           (true batch size, for masking padding)
    # x_ref:    VMEM (TB, C, K*W) f32          (lane-dense batch block of the input)
    # w0_ref:   VMEM (1, 1, K*W)  f32          (W0[k] replicated across its W-block)
    # w1_ref:   VMEM (1, 1, K*W)  f32          (W1 in lanes [0, W), zeros elsewhere)
    # w2_ref:   VMEM (C, C*C)     f32/bf16     (conv2 weight transposed: [c, m]=W2[m,c])
    # b2_ref:   VMEM (1, C*C)     f32
    # out_ref:  VMEM (4, C, C)    f32          (multi-order Chebyshev Laplacian)
    # acc_ref:  VMEM (1, C*C)     f32          (batch-sum accumulator)
    tb, C, KW = x_ref.shape
    W = KW // 4                       # module hard-codes conv0 in_channels = 4

    step = pl.program_id(0)
    last = pl.num_programs(0) - 1

    @pl.when(step == 0)
    def _init():
        acc_ref[...] = jnp.zeros_like(acc_ref)

    b0 = scal_ref[0]
    b1 = scal_ref[1]

    # ---- conv0: scale by per-k weight, then sum the 4 width-blocks of the lane axis
    # with two roll-and-add steps (XLU).  The result is W-periodic along the lanes,
    # so lanes [0, W) hold the valid conv0 output (direction of the roll is
    # irrelevant: the first roll is by half the axis, the second uses its period).
    t = x_ref[...] * w0_ref[...]                             # (tb, C, K*W)
    t = t + pltpu.roll(t, shift=2 * W, axis=2)
    t = t + pltpu.roll(t, shift=W, axis=2)
    y0 = jnp.maximum(t + b0, 0.0)

    # ---- conv1: masked full-lane reduction (W1 lives in lanes [0, W)). ----
    y1 = jnp.maximum(jnp.sum(y0 * w1_ref[...], axis=2) + b1, 0.0)     # (tb, C)

    # ---- conv2: single fused MXU matmul + bias + relu. ----
    z = jnp.dot(y1.astype(w2_ref.dtype), w2_ref[...],
                preferred_element_type=jnp.float32)                   # (tb, C*C)
    z = jnp.maximum(z + b2_ref[...], 0.0)

    # Mask padded batch rows, then accumulate the batch sum.
    row = step * tb + lax.broadcasted_iota(jnp.int32, (tb, 1), 0)
    z = jnp.where(row < nb_ref[0], z, 0.0)
    acc_ref[...] += jnp.sum(z, axis=0, keepdims=True)

    # ---- Laplacian + Chebyshev stack, only on the last grid step. ----
    @pl.when(step == last)
    def _finalize():
        m = acc_ref[...] * scal_ref[2]                       # (1, C*C) batch mean (>= 0)
        # adj = relu(mean) == mean.  Build the (C, C) adjacency from lane chunks
        # (static lane slices + sublane concat, avoiding a (1,C*C)->(C,C) reshape).
        adj = jnp.concatenate([m[:, i * C:(i + 1) * C] for i in range(C)], axis=0)
        adj_t = jnp.transpose(adj)

        deg = jnp.sum(adj, axis=1, keepdims=True)            # (C, 1) pre-symm degree
        ri = lax.broadcasted_iota(jnp.int32, (C, C), 0)
        ci = lax.broadcasted_iota(jnp.int32, (C, C), 1)
        eye = ri == ci
        deg_mat = jnp.where(eye, deg, 0.0)                   # diag(degree)

        d_col = 1.0 / (jnp.sqrt(deg) + 1e-7)                 # (C, 1)
        # Exact row copy of d_col (one nonzero per column -> no reduce-order issue),
        # so L is exactly symmetric like the reference.
        d_row = jnp.sum(jnp.where(eye, d_col, 0.0), axis=0, keepdims=True)   # (1, C)

        # L = Dhat @ (diag(deg) - 0.5*(adj + adj.T)) @ Dhat as broadcasts.
        lap = d_col * (deg_mat - 0.5 * (adj + adj_t)) * d_row
        l2 = 2.0 * jnp.dot(lap, lap, preferred_element_type=jnp.float32)
        l3 = 2.0 * jnp.dot(lap, l2, preferred_element_type=jnp.float32) - lap

        out_ref[0] = jnp.zeros((C, C), dtype=out_ref.dtype)
        out_ref[1] = lap.astype(out_ref.dtype)
        out_ref[2] = l2.astype(out_ref.dtype)
        out_ref[3] = l3.astype(out_ref.dtype)


def graph_learning_forward(x, w0, b0, w1, b1, w2, b2, *,
                           batch_block=256, conv2_bf16=False):
    """Fused GraphLearning forward.

    Args:
      x:  (B, C, 4, W) f32 -- module input (batch, channel, 4, width).
      w0: (4,),   b0: scalar   -- conv0 (1x1, in=4,  out=1).
      w1: (W,),   b1: scalar   -- conv1 (1x1, in=W,  out=1).
      w2: (C*C, C), b2: (C*C,) -- conv2 (1x1, in=C,  out=C*C).
      batch_block: batch rows per grid step (pipelined, accumulated in VMEM).
      conv2_bf16: cast conv2 matmul operands to bf16 (f32 accumulate); only pays off
                  at large B on v6e/v7x, so default off.
    Returns:
      (4, C, C) f32 multi-order Chebyshev Laplacian.
    """
    B, C, K, W = x.shape
    if K != 4:
        raise ValueError("GraphLearning.conv0 expects the third input axis to be 4")
    KW = K * W

    # Contiguous reshape only -- no HBM transpose of the O(B) array.
    x_flat = jnp.asarray(x, jnp.float32).reshape(B, C, KW)

    tb = min(int(batch_block), B)
    n_blocks = pl.cdiv(B, tb)
    b_pad = n_blocks * tb
    if b_pad != B:
        # Zero-pad so every grid block is fully in-bounds; padded rows are masked
        # in-kernel before the batch sum (zero padding is NOT neutral through the
        # conv biases, hence the mask).
        x_flat = jnp.pad(x_flat, ((0, b_pad - B), (0, 0), (0, 0)))

    # Wrapper-side layout plumbing (free, tiny arrays).
    w0f = jnp.asarray(w0, jnp.float32).reshape(K)
    w1f = jnp.asarray(w1, jnp.float32).reshape(W)
    w0_row = jnp.repeat(w0f, W).reshape(1, 1, KW)                 # W0[k] over its W-block
    w1_row = jnp.concatenate(
        [w1f, jnp.zeros((KW - W,), jnp.float32)]).reshape(1, 1, KW)

    w2_dtype = jnp.bfloat16 if conv2_bf16 else jnp.float32
    w2t = jnp.asarray(w2, jnp.float32).reshape(C * C, C).T.astype(w2_dtype)  # (C, C*C)
    b2row = jnp.asarray(b2, jnp.float32).reshape(1, C * C)

    scal = jnp.stack([jnp.asarray(b0, jnp.float32).reshape(()),
                      jnp.asarray(b1, jnp.float32).reshape(()),
                      jnp.asarray(1.0 / B, jnp.float32)])
    nb = jnp.asarray([B], jnp.int32)

    flops = int(5 * B * C * KW + 2 * B * C * C * C + 4 * C ** 3 + 10 * C * C)
    bytes_accessed = int(4 * (b_pad * C * KW + 2 * KW + C * C * C + 5 * C * C + C + 4))

    return pl.pallas_call(
        _graph_learning_kernel,
        out_shape=jax.ShapeDtypeStruct((4, C, C), jnp.float32),
        grid=(n_blocks,),
        in_specs=[
            pl.BlockSpec(memory_space=pltpu.MemorySpace.SMEM),      # [b0, b1, 1/B]
            pl.BlockSpec(memory_space=pltpu.MemorySpace.SMEM),      # [B]
            pl.BlockSpec((tb, C, KW), lambda i: (i, 0, 0)),         # x batch block
            pl.BlockSpec((1, 1, KW), lambda i: (0, 0, 0)),          # conv0 weight row
            pl.BlockSpec((1, 1, KW), lambda i: (0, 0, 0)),          # conv1 weight row
            pl.BlockSpec((C, C * C), lambda i: (0, 0)),             # conv2 weight (C, C*C)
            pl.BlockSpec((1, C * C), lambda i: (0, 0)),             # conv2 bias row
        ],
        out_specs=pl.BlockSpec((4, C, C), lambda i: (0, 0, 0)),
        scratch_shapes=[pltpu.VMEM((1, C * C), jnp.float32)],       # batch-sum accumulator
        compiler_params=pltpu.CompilerParams(dimension_semantics=("arbitrary",)),
        cost_estimate=pl.CostEstimate(flops=flops, transcendentals=2 * C,
                                      bytes_accessed=bytes_accessed),
    )(scal, nb, x_flat, w0_row, w1_row, w2t, b2row)


def _reference_forward(x, w0, b0, w1, b1, w2, b2):
    """Pure-JAX reference implementing the PyTorch GraphLearning.forward math."""
    B, C, K, W = x.shape
    hi = lax.Precision.HIGHEST
    y0 = jax.nn.relu(jnp.einsum("bckw,k->bcw", x, w0, precision=hi) + b0)
    y1 = jax.nn.relu(jnp.einsum("bcw,w->bc", y0, w1, precision=hi) + b1)
    y2 = jax.nn.relu(jnp.einsum("bc,mc->bm", y1, w2, precision=hi) + b2)   # (B, C*C)
    m = jnp.mean(y2.reshape(B, C, C), axis=0)                              # (C, C)
    adj = jax.nn.relu(m)
    degree = jnp.sum(adj, axis=1)
    adj_s = 0.5 * (adj + adj.T)
    deg_l = jnp.diag(degree)
    d_hat = jnp.diag(1.0 / (jnp.sqrt(degree) + 1e-7))
    lap = jnp.matmul(d_hat, jnp.matmul(deg_l - adj_s, d_hat, precision=hi), precision=hi)
    t0 = jnp.zeros((C, C), jnp.float32)
    t2 = 2.0 * jnp.matmul(lap, lap, precision=hi)
    t3 = 2.0 * jnp.matmul(lap, t2, precision=hi) - lap
    return jnp.stack([t0, lap, t2, t3], axis=0)


if __name__ == "__main__":
    key = jax.random.PRNGKey(0)
    kx, k0, k1, k2, kb = jax.random.split(key, 5)

    # Small shapes consistent with the module: input is (batch, channel, 4, width).
    # B = 6 with batch_block = 4 exercises the multi-step grid, the VMEM batch-sum
    # accumulator and the padded-row masking (6 -> padded to 8, 2 grid steps).
    B, C, K, W = 6, 16, 4, 32

    x = jax.random.normal(kx, (B, C, K, W), dtype=jnp.float32)
    w0 = jax.random.normal(k0, (K,), dtype=jnp.float32) * (K ** -0.5)        # conv0.weight
    b0 = jnp.float32(0.1)                                                    # conv0.bias
    w1 = jax.random.normal(k1, (W,), dtype=jnp.float32) * (W ** -0.5)        # conv1.weight
    b1 = jnp.float32(0.1)                                                    # conv1.bias
    w2 = jax.random.normal(k2, (C * C, C), dtype=jnp.float32) * (C ** -0.5)  # conv2.weight
    b2 = jax.random.uniform(kb, (C * C,), dtype=jnp.float32, minval=0.05, maxval=0.2)

    out = graph_learning_forward(x, w0, b0, w1, b1, w2, b2, batch_block=4)
    out = jax.block_until_ready(out)

    ref = _reference_forward(x, w0, b0, w1, b1, w2, b2)
    assert out.shape == (4, C, C), out.shape
    max_err = float(jnp.max(jnp.abs(out - ref)))
    assert jnp.allclose(out, ref, atol=1e-3, rtol=1e-3), f"max abs err = {max_err}"

    print("KERNEL_OK")
</pallas_src>

<mosaic_0001>
module attributes {stable_mosaic.version = 11 : i64} {
  func.func @_graph_learning_kernel(%arg0: i32, %arg1: memref<3xf32, #tpu.memory_space<smem>>, %arg2: memref<1xi32, #tpu.memory_space<smem>>, %arg3: memref<4x16x128xf32, #tpu.memory_space<vmem>>, %arg4: memref<1x1x128xf32, #tpu.memory_space<vmem>>, %arg5: memref<1x1x128xf32, #tpu.memory_space<vmem>>, %arg6: memref<16x256xf32, #tpu.memory_space<vmem>>, %arg7: memref<1x256xf32, #tpu.memory_space<vmem>>, %arg8: memref<4x16x16xf32, #tpu.memory_space<vmem>>, %arg9: memref<1x256xf32, #tpu.memory_space<vmem>>) attributes {dimension_semantics = [#tpu.dimension_semantics<arbitrary>], iteration_bounds = array<i64: 2>, scalar_prefetch = 0 : i64, scratch_operands = 1 : i64, tpu.core_type = #tpu.core_type<tc>, window_params = [{transform_indices = @transform_0, window_bounds = array<i64: 3>}, {transform_indices = @transform_1, window_bounds = array<i64: 1>}, {transform_indices = @transform_2, window_bounds = array<i64: 4, 16, 128>}, {pipeline_mode = #tpu.pipeline_mode<synchronous>, transform_indices = @transform_3, window_bounds = array<i64: 1, 1, 128>}, {pipeline_mode = #tpu.pipeline_mode<synchronous>, transform_indices = @transform_4, window_bounds = array<i64: 1, 1, 128>}, {pipeline_mode = #tpu.pipeline_mode<synchronous>, transform_indices = @transform_5, window_bounds = array<i64: 16, 256>}, {pipeline_mode = #tpu.pipeline_mode<synchronous>, transform_indices = @transform_6, window_bounds = array<i64: 1, 256>}, {pipeline_mode = #tpu.pipeline_mode<synchronous>, transform_indices = @transform_7, window_bounds = array<i64: 4, 16, 16>}]} {
    %c0_i32 = arith.constant 0 : i32
    %0 = arith.cmpi eq, %arg0, %c0_i32 : i32
    %1 = arith.extui %0 : i1 to i32
    %c0_i32_0 = arith.constant 0 : i32
    %2 = arith.cmpi ne, %1, %c0_i32_0 : i32
    scf.if %2 {
      %cst_26 = arith.constant 0.000000e+00 : f32
      %51 = vector.broadcast %cst_26 : f32 to vector<1x256xf32>
      %c0_27 = arith.constant 0 : index
      %c0_28 = arith.constant 0 : index
      %52 = vector.load %arg9[%c0_27, %c0_28] : memref<1x256xf32, #tpu.memory_space<vmem>>, vector<1x256xf32>
      tpu.vector_store %arg9[%c0_27, %c0_28], %51 {strides = array<i32>} : memref<1x256xf32, #tpu.memory_space<vmem>>, vector<1x256xf32>,
    } else {
    }
    %c0 = arith.constant 0 : index
    %3 = memref.load %arg1[%c0] : memref<3xf32, #tpu.memory_space<smem>>
    %c1 = arith.constant 1 : index
    %4 = memref.load %arg1[%c1] : memref<3xf32, #tpu.memory_space<smem>>
    %c0_1 = arith.constant 0 : index
    %c0_2 = arith.constant 0 : index
    %c0_3 = arith.constant 0 : index
    %5 = vector.load %arg3[%c0_1, %c0_2, %c0_3] : memref<4x16x128xf32, #tpu.memory_space<vmem>>, vector<4x16x128xf32>
    %c0_4 = arith.constant 0 : index
    %c0_5 = arith.constant 0 : index
    %c0_6 = arith.constant 0 : index
    %6 = vector.load %arg4[%c0_4, %c0_5, %c0_6] : memref<1x1x128xf32, #tpu.memory_space<vmem>>, vector<1x1x128xf32>
    %7 = vector.broadcast %6 : vector<1x1x128xf32> to vector<4x16x128xf32>
    %8 = arith.mulf %5, %7 : vector<4x16x128xf32>
    %c64_i32 = arith.constant 64 : i32
    %9 = tpu.dynamic_rotate %8 by %c64_i32 dim 2 : vector<4x16x128xf32>, i32 -> vector<4x16x128xf32>
    %10 = arith.addf %8, %9 : vector<4x16x128xf32>
    %c32_i32 = arith.constant 32 : i32
    %11 = tpu.dynamic_rotate %10 by %c32_i32 dim 2 : vector<4x16x128xf32>, i32 -> vector<4x16x128xf32>
    %12 = arith.addf %10, %11 : vector<4x16x128xf32>
    %13 = vector.broadcast %3 : f32 to vector<4x16x128xf32>
    %14 = arith.addf %12, %13 : vector<4x16x128xf32>
    %cst = arith.constant 0.000000e+00 : f32
    %15 = vector.broadcast %cst : f32 to vector<4x16x128xf32>
    %16 = arith.maximumf %14, %15 : vector<4x16x128xf32>
    %c0_7 = arith.constant 0 : index
    %c0_8 = arith.constant 0 : index
    %c0_9 = arith.constant 0 : index
    %17 = vector.load %arg5[%c0_7, %c0_8, %c0_9] : memref<1x1x128xf32, #tpu.memory_space<vmem>>, vector<1x1x128xf32>
    %18 = vector.broadcast %17 : vector<1x1x128xf32> to vector<4x16x128xf32>
    %19 = arith.mulf %16, %18 : vector<4x16x128xf32>
    %cst_10 = arith.constant dense<0.000000e+00> : vector<4x16xf32>
    %20 = vector.multi_reduction <add>, %19, %cst_10 [2] : vector<4x16x128xf32> to vector<4x16xf32>
    %21 = vector.broadcast %4 : f32 to vector<4x16xf32>
    %22 = arith.addf %20, %21 : vector<4x16xf32>
    %cst_11 = arith.constant 0.000000e+00 : f32
    %23 = vector.broadcast %cst_11 : f32 to vector<4x16xf32>
    %24 = arith.maximumf %22, %23 : vector<4x16xf32>
    %c0_12 = arith.constant 0 : index
    %c0_13 = arith.constant 0 : index
    %25 = vector.load %arg6[%c0_12, %c0_13] : memref<16x256xf32, #tpu.memory_space<vmem>>, vector<16x256xf32>
    %cst_14 = arith.constant dense<0.000000e+00> : vector<4x256xf32>
    %26 = tpu.matmul %24, %25, %cst_14 {dimension_numbers = #tpu.dot_dimension_numbers<[1], [0], [0], [1], [0, 0, 1, 1], [], []>} : vector<4x16xf32>, vector<16x256xf32>, vector<4x256xf32> -> vector<4x256xf32>
    %c0_15 = arith.constant 0 : index
    %c0_16 = arith.constant 0 : index
    %27 = vector.load %arg7[%c0_15, %c0_16] : memref<1x256xf32, #tpu.memory_space<vmem>>, vector<1x256xf32>
    %28 = vector.broadcast %27 : vector<1x256xf32> to vector<4x256xf32>
    %29 = arith.addf %26, %28 : vector<4x256xf32>
    %cst_17 = arith.constant 0.000000e+00 : f32
    %30 = vector.broadcast %cst_17 : f32 to vector<4x256xf32>
    %31 = arith.maximumf %29, %30 : vector<4x256xf32>
    %c4_i32 = arith.constant 4 : i32
    %32 = arith.muli %arg0, %c4_i32 : i32
    %33 = tpu.iota {dimensions = array<i32: 0>} : vector<4x1xi32>
    %34 = vector.broadcast %32 : i32 to vector<4x1xi32>
    %35 = arith.addi %34, %33 : vector<4x1xi32>
    %c0_18 = arith.constant 0 : index
    %36 = memref.load %arg2[%c0_18] : memref<1xi32, #tpu.memory_space<smem>>
    %37 = vector.broadcast %36 : i32 to vector<4x1xi32>
    %38 = arith.cmpi slt, %35, %37 : vector<4x1xi32>
    %cst_19 = arith.constant 0.000000e+00 : f32
    %39 = vector.shape_cast %38 : vector<4x1xi1> to vector<4x1xi1>
    %40 = vector.broadcast %39 : vector<4x1xi1> to vector<4x256xi1>
    %41 = vector.broadcast %cst_19 : f32 to vector<4x256xf32>
    %42 = arith.select %40, %31, %41 : vector<4x256xi1>, vector<4x256xf32>
    %c0_20 = arith.constant 0 : index
    %c0_21 = arith.constant 0 : index
    %43 = vector.load %arg9[%c0_20, %c0_21] : memref<1x256xf32, #tpu.memory_space<vmem>>, vector<1x256xf32>
    %cst_22 = arith.constant dense<0.000000e+00> : vector<256xf32>
    %44 = vector.multi_reduction <add>, %42, %cst_22 [0] : vector<4x256xf32> to vector<256xf32>
    %45 = vector.shape_cast %44 : vector<256xf32> to vector<1x256xf32>
    %46 = arith.addf %43, %45 : vector<1x256xf32>
    %c0_23 = arith.constant 0 : index
    %c0_24 = arith.constant 0 : index
    %47 = vector.load %arg9[%c0_23, %c0_24] : memref<1x256xf32, #tpu.memory_space<vmem>>, vector<1x256xf32>
    tpu.vector_store %arg9[%c0_23, %c0_24], %46 {strides = array<i32>} : memref<1x256xf32, #tpu.memory_space<vmem>>, vector<1x256xf32>,
    %c1_i32 = arith.constant 1 : i32
    %48 = arith.cmpi eq, %arg0, %c1_i32 : i32
    %49 = arith.extui %48 : i1 to i32
    %c0_i32_25 = arith.constant 0 : i32
    %50 = arith.cmpi ne, %49, %c0_i32_25 : i32
    scf.if %50 {
      %c0_26 = arith.constant 0 : index
      %c0_27 = arith.constant 0 : index
      %51 = vector.load %arg9[%c0_26, %c0_27] : memref<1x256xf32, #tpu.memory_space<vmem>>, vector<1x256xf32>
      %c2 = arith.constant 2 : index
      %52 = memref.load %arg1[%c2] : memref<3xf32, #tpu.memory_space<smem>>
      %53 = vector.broadcast %52 : f32 to vector<1x256xf32>
      %54 = arith.mulf %51, %53 : vector<1x256xf32>
      %55 = vector.extract_strided_slice %54 {offsets = [0, 0], sizes = [1, 16], strides = [1, 1]} : vector<1x256xf32> to vector<1x16xf32>
      %56 = vector.extract_strided_slice %54 {offsets = [0, 16], sizes = [1, 16], strides = [1, 1]} : vector<1x256xf32> to vector<1x16xf32>
      %57 = vector.extract_strided_slice %54 {offsets = [0, 32], sizes = [1, 16], strides = [1, 1]} : vector<1x256xf32> to vector<1x16xf32>
      %58 = vector.extract_strided_slice %54 {offsets = [0, 48], sizes = [1, 16], strides = [1, 1]} : vector<1x256xf32> to vector<1x16xf32>
      %59 = vector.extract_strided_slice %54 {offsets = [0, 64], sizes = [1, 16], strides = [1, 1]} : vector<1x256xf32> to vector<1x16xf32>
      %60 = vector.extract_strided_slice %54 {offsets = [0, 80], sizes = [1, 16], strides = [1, 1]} : vector<1x256xf32> to vector<1x16xf32>
      %61 = vector.extract_strided_slice %54 {offsets = [0, 96], sizes = [1, 16], strides = [1, 1]} : vector<1x256xf32> to vector<1x16xf32>
      %62 = vector.extract_strided_slice %54 {offsets = [0, 112], sizes = [1, 16], strides = [1, 1]} : vector<1x256xf32> to vector<1x16xf32>
      %63 = vector.extract_strided_slice %54 {offsets = [0, 128], sizes = [1, 16], strides = [1, 1]} : vector<1x256xf32> to vector<1x16xf32>
      %64 = vector.extract_strided_slice %54 {offsets = [0, 144], sizes = [1, 16], strides = [1, 1]} : vector<1x256xf32> to vector<1x16xf32>
      %65 = vector.extract_strided_slice %54 {offsets = [0, 160], sizes = [1, 16], strides = [1, 1]} : vector<1x256xf32> to vector<1x16xf32>
      %66 = vector.extract_strided_slice %54 {offsets = [0, 176], sizes = [1, 16], strides = [1, 1]} : vector<1x256xf32> to vector<1x16xf32>
      %67 = vector.extract_strided_slice %54 {offsets = [0, 192], sizes = [1, 16], strides = [1, 1]} : vector<1x256xf32> to vector<1x16xf32>
      %68 = vector.extract_strided_slice %54 {offsets = [0, 208], sizes = [1, 16], strides = [1, 1]} : vector<1x256xf32> to vector<1x16xf32>
      %69 = vector.extract_strided_slice %54 {offsets = [0, 224], sizes = [1, 16], strides = [1, 1]} : vector<1x256xf32> to vector<1x16xf32>
      %70 = vector.extract_strided_slice %54 {offsets = [0, 240], sizes = [1, 16], strides = [1, 1]} : vector<1x256xf32> to vector<1x16xf32>
      %71 = tpu.concatenate %55, %56, %57, %58, %59, %60, %61, %62, %63, %64, %65, %66, %67, %68, %69, %70 in 0 : vector<1x16xf32>, vector<1x16xf32>, vector<1x16xf32>, vector<1x16xf32>, vector<1x16xf32>, vector<1x16xf32>, vector<1x16xf32>, vector<1x16xf32>, vector<1x16xf32>, vector<1x16xf32>, vector<1x16xf32>, vector<1x16xf32>, vector<1x16xf32>, vector<1x16xf32>, vector<1x16xf32>, vector<1x16xf32> -> vector<16x16xf32>
      %72 = tpu.transpose %71, [1, 0] : vector<16x16xf32> -> vector<16x16xf32>
      %cst_28 = arith.constant dense<0.000000e+00> : vector<16xf32>
      %73 = vector.multi_reduction <add>, %71, %cst_28 [1] : vector<16x16xf32> to vector<16xf32>
      %74 = vector.shape_cast %73 : vector<16xf32> to vector<16x1xf32>
      %75 = tpu.iota {dimensions = array<i32: 0>} : vector<16x16xi32>
      %76 = tpu.iota {dimensions = array<i32: 1>} : vector<16x16xi32>
      %77 = arith.cmpi eq, %75, %76 : vector<16x16xi32>
      %cst_29 = arith.constant 0.000000e+00 : f32
      %78 = vector.shape_cast %74 : vector<16x1xf32> to vector<16x1xf32>
      %79 = vector.broadcast %78 : vector<16x1xf32> to vector<16x16xf32>
      %80 = vector.broadcast %cst_29 : f32 to vector<16x16xf32>
      %81 = arith.select %77, %79, %80 : vector<16x16xi1>, vector<16x16xf32>
      %82 = math.sqrt %74 : vector<16x1xf32>
      %cst_30 = arith.constant 1.000000e-07 : f32
      %83 = vector.broadcast %cst_30 : f32 to vector<16x1xf32>
      %84 = arith.addf %82, %83 : vector<16x1xf32>
      %cst_31 = arith.constant 1.000000e+00 : f32
      %85 = vector.broadcast %cst_31 : f32 to vector<16x1xf32>
      %86 = arith.divf %85, %84 : vector<16x1xf32>
      %cst_32 = arith.constant 0.000000e+00 : f32
      %87 = vector.shape_cast %86 : vector<16x1xf32> to vector<16x1xf32>
      %88 = vector.broadcast %87 : vector<16x1xf32> to vector<16x16xf32>
      %89 = vector.broadcast %cst_32 : f32 to vector<16x16xf32>
      %90 = arith.select %77, %88, %89 : vector<16x16xi1>, vector<16x16xf32>
      %cst_33 = arith.constant dense<0.000000e+00> : vector<16xf32>
      %91 = vector.multi_reduction <add>, %90, %cst_33 [0] : vector<16x16xf32> to vector<16xf32>
      %92 = vector.shape_cast %91 : vector<16xf32> to vector<1x16xf32>
      %93 = arith.addf %71, %72 : vector<16x16xf32>
      %cst_34 = arith.constant 5.000000e-01 : f32
      %94 = vector.broadcast %cst_34 : f32 to vector<16x16xf32>
      %95 = arith.mulf %94, %93 : vector<16x16xf32>
      %96 = arith.subf %81, %95 : vector<16x16xf32>
      %97 = vector.broadcast %86 : vector<16x1xf32> to vector<16x16xf32>
      %98 = arith.mulf %97, %96 : vector<16x16xf32>
      %99 = vector.broadcast %92 : vector<1x16xf32> to vector<16x16xf32>
      %100 = arith.mulf %98, %99 : vector<16x16xf32>
      %cst_35 = arith.constant dense<0.000000e+00> : vector<16x16xf32>
      %101 = tpu.matmul %100, %100, %cst_35 {dimension_numbers = #tpu.dot_dimension_numbers<[1], [0], [0], [1], [0, 0, 1, 1], [], []>} : vector<16x16xf32>, vector<16x16xf32>, vector<16x16xf32> -> vector<16x16xf32>
      %cst_36 = arith.constant 2.000000e+00 : f32
      %102 = vector.broadcast %cst_36 : f32 to vector<16x16xf32>
      %103 = arith.mulf %102, %101 : vector<16x16xf32>
      %cst_37 = arith.constant dense<0.000000e+00> : vector<16x16xf32>
      %104 = tpu.matmul %100, %103, %cst_37 {dimension_numbers = #tpu.dot_dimension_numbers<[1], [0], [0], [1], [0, 0, 1, 1], [], []>} : vector<16x16xf32>, vector<16x16xf32>, vector<16x16xf32> -> vector<16x16xf32>
      %cst_38 = arith.constant 2.000000e+00 : f32
      %105 = vector.broadcast %cst_38 : f32 to vector<16x16xf32>
      %106 = arith.mulf %105, %104 : vector<16x16xf32>
      %107 = arith.subf %106, %100 : vector<16x16xf32>
      %cst_39 = arith.constant 0.000000e+00 : f32
      %108 = vector.broadcast %cst_39 : f32 to vector<16x16xf32>
      %c0_40 = arith.constant 0 : index
      %c0_41 = arith.constant 0 : index
      %c0_42 = arith.constant 0 : index
      %109 = vector.load %arg8[%c0_40, %c0_41, %c0_42] : memref<4x16x16xf32, #tpu.memory_space<vmem>>, vector<1x16x16xf32>
      %110 = vector.shape_cast %109 : vector<1x16x16xf32> to vector<16x16xf32>
      %111 = vector.shape_cast %108 : vector<16x16xf32> to vector<1x16x16xf32>
      tpu.vector_store %arg8[%c0_40, %c0_41, %c0_42], %111 {strides = array<i32>} : memref<4x16x16xf32, #tpu.memory_space<vmem>>, vector<1x16x16xf32>,
      %c1_43 = arith.constant 1 : index
      %c0_44 = arith.constant 0 : index
      %c0_45 = arith.constant 0 : index
      %112 = vector.load %arg8[%c1_43, %c0_44, %c0_45] : memref<4x16x16xf32, #tpu.memory_space<vmem>>, vector<1x16x16xf32>
      %113 = vector.shape_cast %112 : vector<1x16x16xf32> to vector<16x16xf32>
      %114 = vector.shape_cast %100 : vector<16x16xf32> to vector<1x16x16xf32>
      tpu.vector_store %arg8[%c1_43, %c0_44, %c0_45], %114 {strides = array<i32>} : memref<4x16x16xf32, #tpu.memory_space<vmem>>, vector<1x16x16xf32>,
      %c2_46 = arith.constant 2 : index
      %c0_47 = arith.constant 0 : index
      %c0_48 = arith.constant 0 : index
      %115 = vector.load %arg8[%c2_46, %c0_47, %c0_48] : memref<4x16x16xf32, #tpu.memory_space<vmem>>, vector<1x16x16xf32>
      %116 = vector.shape_cast %115 : vector<1x16x16xf32> to vector<16x16xf32>
      %117 = vector.shape_cast %103 : vector<16x16xf32> to vector<1x16x16xf32>
      tpu.vector_store %arg8[%c2_46, %c0_47, %c0_48], %117 {strides = array<i32>} : memref<4x16x16xf32, #tpu.memory_space<vmem>>, vector<1x16x16xf32>,
      %c3 = arith.constant 3 : index
      %c0_49 = arith.constant 0 : index
      %c0_50 = arith.constant 0 : index
      %118 = vector.load %arg8[%c3, %c0_49, %c0_50] : memref<4x16x16xf32, #tpu.memory_space<vmem>>, vector<1x16x16xf32>
      %119 = vector.shape_cast %118 : vector<1x16x16xf32> to vector<16x16xf32>
      %120 = vector.shape_cast %107 : vector<16x16xf32> to vector<1x16x16xf32>
      tpu.vector_store %arg8[%c3, %c0_49, %c0_50], %120 {strides = array<i32>} : memref<4x16x16xf32, #tpu.memory_space<vmem>>, vector<1x16x16xf32>,
    } else {
    }
    return
  }
  func.func @transform_0(%arg0: i32) -> i32 {
    %c0_i32 = arith.constant 0 : i32
    %c0_i32_0 = arith.constant 0 : i32
    return %c0_i32 : i32
  }
  func.func @transform_1(%arg0: i32) -> i32 {
    %c0_i32 = arith.constant 0 : i32
    %c0_i32_0 = arith.constant 0 : i32
    return %c0_i32 : i32
  }
  func.func @transform_2(%arg0: i32) -> (i32, i32, i32) {
    %c0_i32 = arith.constant 0 : i32
    %c0_i32_0 = arith.constant 0 : i32
    %c0_i32_1 = arith.constant 0 : i32
    return %arg0, %c0_i32, %c0_i32_0 : i32, i32, i32
  }
  func.func @transform_3(%arg0: i32) -> (i32, i32, i32) {
    %c0_i32 = arith.constant 0 : i32
    %c0_i32_0 = arith.constant 0 : i32
    %c0_i32_1 = arith.constant 0 : i32
    %c0_i32_2 = arith.constant 0 : i32
    return %c0_i32, %c0_i32_0, %c0_i32_1 : i32, i32, i32
  }
  func.func @transform_4(%arg0: i32) -> (i32, i32, i32) {
    %c0_i32 = arith.constant 0 : i32
    %c0_i32_0 = arith.constant 0 : i32
    %c0_i32_1 = arith.constant 0 : i32
    %c0_i32_2 = arith.constant 0 : i32
    return %c0_i32, %c0_i32_0, %c0_i32_1 : i32, i32, i32
  }
  func.func @transform_5(%arg0: i32) -> (i32, i32) {
    %c0_i32 = arith.constant 0 : i32
    %c0_i32_0 = arith.constant 0 : i32
    %c0_i32_1 = arith.constant 0 : i32
    return %c0_i32, %c0_i32_0 : i32, i32
  }
  func.func @transform_6(%arg0: i32) -> (i32, i32) {
    %c0_i32 = arith.constant 0 : i32
    %c0_i32_0 = arith.constant 0 : i32
    %c0_i32_1 = arith.constant 0 : i32
    return %c0_i32, %c0_i32_0 : i32, i32
  }
  func.func @transform_7(%arg0: i32) -> (i32, i32, i32) {
    %c0_i32 = arith.constant 0 : i32
    %c0_i32_0 = arith.constant 0 : i32
    %c0_i32_1 = arith.constant 0 : i32
    %c0_i32_2 = arith.constant 0 : i32
    return %c0_i32, %c0_i32_0, %c0_i32_1 : i32, i32, i32
  }
}

</mosaic_0001>

<bundles_post_ra>
// kernel: tpu_custom_call.1
= control target key start
LH: loop header
LB: loop body
LE: loop exit
PB: predicated region body
PF: predicated region fallthrough
CT: control target
= control target key end

     0   :  { %s1711_s0 = inlined_call_operand.vmem [shape: f32[3], index: 0, kind: input, shape index: {}]   ;;  %s1712_s1 = inlined_call_operand.<no memory space> [shape: s32[1], index: 1, kind: input, shape index: {}]   ;;  %s1713_s2 = inlined_call_operand.hbm [shape: f32[8,16,128], index: 2, kind: input, shape index: {}]   ;;  %s1714_s3 = inlined_call_operand.vmem [shape: f32[1,1,128], index: 3, kind: input, shape index: {}]   ;;  %s1715_s4 = inlined_call_operand.vmem [shape: f32[1,1,128], index: 4, kind: input, shape index: {}]   ;;  %s1716_s5 = inlined_call_operand.hbm [shape: f32[16,256], index: 5, kind: input, shape index: {}]   ;;  %s1717_s6 = inlined_call_operand.vmem [shape: f32[1,256], index: 6, kind: input, shape index: {}]   ;;  %s1718_s7 = inlined_call_operand.hbm [shape: f32[4,16,16], index: 7, kind: output, shape index: {}]  }
   0x1   :  { %12 = sst [smem:[#allocation3]] %s1712_s1 }
   0x2   :  { %13 = vsyncpa [#allocation7], 0 }
   0x3   :  { %14 = vsyncpa [#allocation5], 0 }
   0x4   :  { %16 = vsyncpa [#allocation5 + $0x1], 0 }
   0x5   :  { %17 = vsyncpa [#allocation10], 0 }
   0x6   :  { %18 = vsyncpa [#allocation6], 0  ;;  %s1452_s26 = smov 0   ;;  %s1454_s27 = smov 0  }
   0x7   :  { %s1456_s28 = smov 0   ;;  %s1458_s29 = smov 0  }
   0x8 LB: > { %s1471_s1 = sadd.s32 4294967295, %s1384_s29   ;;  %s1474_s30 = sadd.s32 1, %s1384_s29   ;;  %s1384_s29 = sphi %s1458_s29, %s1735_s29   ;;  %s1380_s28 = sphi %s1456_s28, %s1734_s28   ;;  %s1376_s27 = sphi %s1454_s27, %s1733_s27   ;;  %s1372_s26 = sphi %s1452_s26, %s1732_s26  }
   0x9   : > { %s70_s8 = ssub.s32 %s1384_s29, %s1474_s30  ;;  %s73_s9 = sadd.s32 1, %s1380_s28 }
   0xa   : > { %p71_p0 = scmp.eq.s32.totalorder %s70_s8, 0  ;;  %p80_p1 = scmp.ne.s32.totalorder %s1380_s28, %s1376_s27 }
   0xb   : > { %p81_p2 = scmp.eq.s32.totalorder %s1384_s29, 0  ;;  %p86_p3 = scmp.ne.s32.totalorder %s1376_s27, %s1372_s26 }
   0xc   : > { %s1484_s10 = scalar_select %p71_p0, %s1380_s28, %s73_s9  }
   0xd   : > { %p1486_p4 = por %p81_p2, %p80_p1  ;;  %p1719_p5 = scmp.eq.s32.totalorder %s1471_s1, 0 }
   0xe   : > { %p1081_p6 = scmp.ge.s32.totalorder %s1384_s29, 1  ;;  %p202_p7 = scmp.lt.s32.totalorder %s1384_s29, 3 }
   0xf   : > { %p1495_p8 = por %p1719_p5, %p86_p3  ;;  %s215_s16 = sshll.u32 %s1711_s0, 4  ;;  %s216_s16 = int_to_ptr.vmem [resolvable:$true] %s215_s16 }
  0x10   : > { %p1500_p10 = pnand %p1081_p6, %p202_p7  ;;  %p1172_p12 = scmp.lt.s32.totalorder %s1384_s29, 2 }
  0x11   : > { %s1722_s12 = scalar_select %p1495_p8, 1, 0 }
  0x12   : > { %p1159_p11 = pneg %p1500_p10  ;;  %s1386_s18 = smov [#allocation9]  }
  0x13   : > { %s234_s19 = sshll.u32 %s1386_s18, 4  ;;  %p1518_p0 = pnand %p1172_p12, %p1486_p4  ;;  %s1522_s19 = int_to_ptr.vmem [resolvable:$true] %s234_s19 }
  0x14   : > { %p1512_p13 = pnand %p1159_p11, %p1719_p5  ;;  %s1239_s21 = scalar_lea.vmem %s216_s16, 16 }
  0x15   : > { %p1240_p1 = scmp.ne.s32.totalorder %s216_s16, %s1239_s21  ;;  %p1247_p7 = scmp.lt.s32.totalorder %s216_s16, %s216_s16 }
  0x16   : > { %p1241_p2 = pneg %p1512_p13  ;;  %p1248_p11 = scmp.lt.s32.totalorder %s1239_s21, %s1239_s21 }
  0x18   : > { %p1242_p3 = pnand %p1241_p2, %p1240_p1  ;;  %p1249_p9 = por %p1248_p11, %p1247_p7 }
  0x1a   : > { %p1243_p6 = pneg %p1242_p3 }
  0x1c   : > { %p1250_p5 = pnand %p1249_p9, %p1243_p6 }
  0x1e   : > { %1253 = shalt.err (!%p1250_p5)
}
  0x1f   : > { %s1387_s22 = smov [#allocation4]   ;;  %s1254_s25 = scalar_lea.hbm %s1716_s5, 512 }
  0x20   : > { %1162 = dma.vmem_to_smem (!%p1512_p13), %s216_s16, 16, %s1387_s22, [#allocation7]  }
  0x21   : > { %p1255_p4 = scmp.ne.s32.totalorder %s1716_s5, %s1254_s25  ;;  %p1261_p5 = scmp.lt.u32.totalorder %s1254_s25, %s1716_s5 }
  0x23   : > { %p1257_p12 = pnand %p1255_p4, %p1241_p2 }
  0x25   : > { %p1258_p1 = pneg %p1257_p12 }
  0x27   : > { %p1263_p9 = pnand %p1261_p5, %p1258_p1 }
  0x29   : > { %1266 = shalt.err (!%p1263_p9)
}
  0x2a   : > { %s1267_s14 = scalar_lea.vmem %s1522_s19, 512  ;;  %p1275_p11 = scmp.lt.s32.totalorder %s1522_s19, %s1522_s19 }
  0x2b   : > { %p1268_p3 = scmp.ne.s32.totalorder %s1522_s19, %s1267_s14  ;;  %p1276_p4 = scmp.lt.s32.totalorder %s1267_s14, %s1267_s14 }
  0x2d   : > { %p1270_p6 = pnand %p1268_p3, %p1241_p2  ;;  %p1277_p12 = por %p1276_p4, %p1275_p11 }
  0x2f   : > { %p1271_p7 = pneg %p1270_p6 }
  0x31   : > { %p1278_p8 = pnand %p1277_p12, %p1271_p7 }
  0x33   : > { %1281 = shalt.err (!%p1278_p8)
}
  0x34   : > { %s1388_s15 = smov 256   ;;  %s1389_s16 = smov 16  }
  0x35   : > { %1165 = dma.hbm_to_vmem [thread:$0]  (!%p1512_p13), %s1716_s5, 512, %s1522_s19, [#allocation10], %s1388_s15, %s1388_s15, %s1389_s16  }
  0x36   : > { %s251_s22 = sand.u32 1, %s1380_s28   ;;  %s1110_s23 = sshll.u32 %s1384_s29, 10 }
  0x37   : > { %s1085_s24 = sshll.u32 %s251_s22, 6  ;;  %s1561_s8 = scalar_lea.hbm %s1713_s2, %s1110_s23 }
  0x38   : > { %s255_s9 = scalar_lea.vmem [#allocation8], %s1085_s24  ;;  %s1565_s17 = scalar_lea.sflag [#allocation5], %s251_s22 }
  0x39   : > { %s263_s11 = sshll.u32 %s255_s9, 4  ;;  %s1282_s14 = scalar_lea.hbm %s1561_s8, 1024  ;;  %s1563_s11 = int_to_ptr.vmem [resolvable:$true] %s263_s11 }
  0x3a   : > { %p1283_p8 = scmp.ne.s32.totalorder %s1561_s8, %s1282_s14  ;;  %p1284_p13 = pneg %p1518_p0 }
  0x3b   : > { %s1287_s15 = scalar_lea.hbm %s1713_s2, 2048  ;;  %p1288_p5 = scmp.lt.u32.totalorder %s1561_s8, %s1713_s2 }
  0x3c   : > { %p1285_p2 = pnand %p1284_p13, %p1283_p8  ;;  %p1289_p9 = scmp.lt.u32.totalorder %s1287_s15, %s1282_s14 }
  0x3d   : > { %p1291_p6 = scmp.lt.u32.totalorder %s1282_s14, %s1561_s8 }
  0x3e   : > { %p1286_p1 = pneg %p1285_p2  ;;  %p1290_p3 = por %p1289_p9, %p1288_p5 }
  0x40   : > { %p1292_p7 = por %p1291_p6, %p1290_p3 }
  0x42   : > { %p1293_p11 = pnand %p1292_p7, %p1286_p1 }
  0x44   : > { %1296 = shalt.err (!%p1293_p11)
}
  0x45   : > { %s1297_s21 = scalar_lea.vmem %s1563_s11, 1024  ;;  %s1390_s22 = smov [#allocation8]  }
  0x46   : > { %p1298_p4 = scmp.ne.s32.totalorder %s1563_s11, %s1297_s21  ;;  %s1302_s23 = sshll.u32 %s1390_s22, 4  ;;  %s1303_s23 = int_to_ptr.vmem [resolvable:$false] %s1302_s23 }
  0x47   : > { %s1304_s24 = scalar_lea.vmem %s1303_s23, 2048  ;;  %p1305_p2 = scmp.lt.s32.totalorder %s1563_s11, %s1303_s23 }
  0x48   : > { %p1300_p12 = pnand %p1298_p4, %p1284_p13  ;;  %p1306_p5 = scmp.lt.s32.totalorder %s1304_s24, %s1297_s21 }
  0x4a   : > { %p1301_p8 = pneg %p1300_p12  ;;  %p1307_p9 = por %p1306_p5, %p1305_p2 }
  0x4c   : > { %p1308_p3 = pnand %p1307_p9, %p1301_p8 }
  0x4e   : > { %1311 = shalt.err (!%p1308_p3)
}
  0x4f   : > { %s1391_s25 = smov 128   ;;  %s1392_s26 = smov 8  }
  0x50   : > { %1169 = dma.hbm_to_vmem [thread:$0]  (!%p1518_p0), %s1561_s8, 1024, %s1563_s11, %s1565_s17, %s1391_s25, %s1391_s25, %s1392_s26  }
  0x51   : > { %275 = sbr.rel (%p1500_p10) target bundleno = 1568 (0x620), region = 48  ;;  %p1726_p13 = scmp.eq.s32.totalorder (!%p1500_p10), %s1471_s1, 0 }
  0x58   : > { %1355 = dma.done.wait (%p1726_p13), [#allocation7], 16   ;;  %p1727_p1 = pmov %p1726_p13 }
  0x59   : > { %s281_s9 = sand.u32 1, %s1376_s27   ;;  %p1728_p6 = scmp.ne.s32.totalorder %s1722_s12, 0 }
  0x5a   : > { %1357 = vsyncadd (%p1727_p1), [#allocation7], 4294967280  ;;  %s1091_s14 = sshll.u32 %s281_s9, 6  ;;  %s282_s29 = scalar_lea.sflag [#allocation5], %s281_s9 }
  0x5b   : > { %s1600_s19 = scalar_lea.vmem [#allocation8], %s1091_s14 }
  0x5c   : > { %1359 = dma.done.wait (%p1728_p6), %s282_s29, 1024  }
  0x5d   : > { %1361 = vsyncadd (%p1728_p6), %s282_s29, 4294966272  ;;  %p1729_p10 = pmov %p1727_p1 }
  0x5e   : > { %p1730_p0 = pmov %p1727_p1 }
  0x5f   : > { %1363 = dma.done.wait (%p1729_p10), [#allocation10], 512  }
  0x60   : > { %1365 = vsyncadd (%p1730_p0), [#allocation10], 4294966784 }
  0x61   : > { %294 = sfence }
  0x62   : > { %p1731_p7 = scmp.ne.s32.totalorder %s1471_s1, 0 }
  0x63   : > { %v321_v0 = vlaneseq (!%p1731_p7)  ;;  %v1393_v1 = vmov (!%p1731_p7), 0.0  }
  0x64   : > { %320 = sbr.rel (%p1731_p7) target bundleno = 107 (0x6b), region = 64 }
  0x65   : > { %vm323_vm0 = vcmp.lt.s32.totalorder (!%p1731_p7), %v321_v0, 256 }
  0x66   : > { %325 = vst.msk [vmem:[#allocation2] sm:$0x3] (!%p1731_p7), %vm323_vm0, %v1393_v1 }
  0x6b PF: > { %v328_v2 = vld [vmem:[%s1600_s19] sm:$0xff]  ;;  %v1095_v3 = vld [vmem:[%s1714_s3] ss:$0 sm:$0xff]  ;;  %v330_v4 = vld [vmem:[%s1600_s19 + $0x10] sm:$0xff]  ;;  %s1394_s20 = smov 64   ;;  %s1395_s8 = smov 32  }
  0x6c   : > { %v343_v5 = vmul.f32 %v1095_v3, %v328_v2  ;;  %v345_v6 = vmul.f32 %v1095_v3, %v330_v4  ;;  %v329_v7 = vld [vmem:[%s1600_s19 + $0x8] sm:$0xff]  ;;  %v331_v8 = vld [vmem:[%s1600_s19 + $0x18] sm:$0xff]  ;;  %v332_v11 = vld [vmem:[%s1600_s19 + $0x20] sm:$0xff]  ;;  %s326_s11 = sld [smem:[#allocation4]]  ;;  %s1094_s16 = sld [smem:[#allocation4 + $0x1]]  ;;  %vm499_vm1 = vcmask 130112  }
  0x6d   : > { %v344_v9 = vmul.f32 %v1095_v3, %v329_v7  ;;  %v346_v10 = vmul.f32 %v1095_v3, %v331_v8  ;;  %v333_v12 = vld [vmem:[%s1600_s19 + $0x28] sm:$0xff]  ;;  %v347_v13 = vmul.f32 %v1095_v3, %v332_v11  ;;  %v334_v15 = vld [vmem:[%s1600_s19 + $0x30] sm:$0xff]  ;;  %v335_v16 = vld [vmem:[%s1600_s19 + $0x38] sm:$0xff]  ;;  %vm528_vm2 = vcmask 1041409   ;;  %s615_s18 = sld [smem:[#allocation3]]  ;;  %s1098_s21 = sshll.u32 %s1471_s1, 2 }
  0x6e   : > { %351 = vrot.lane.b32.xlu0 %v343_v5, %s1394_s20  ;;  %355 = vrot.lane.b32.xlu1 %v345_v6, %s1394_s20  ;;  %v348_v14 = vmul.f32 %v1095_v3, %v333_v12  ;;  %v349_v17 = vmul.f32 %v1095_v3, %v334_v15  ;;  %v350_v18 = vmul.f32 %v1095_v3, %v335_v16  ;;  %v1096_v41 = vld [vmem:[%s1715_s4] ss:$0 sm:$0xff]  ;;  %v464_v16 = vld [vmem:[#allocation9] sm:$0xff]  ;;  %vm530_vm3 = vcmask 1042434   ;;  %p1099_p11 = scmp.ne.s32.totalorder %s1471_s1, 1 }
  0x6f   : > { %vm532_vm4 = vcmask 1043459   ;;  %vm534_vm5 = vcmask 130048   ;;  %vm623_vm7 = vcmask 1043456   ;;  %s1100_s24 = sld [smem:[#allocation4 + $0x2]] (!%p1099_p11)  ;;  %s1398_s25 = smov (!%p1099_p11), 96   ;;  %vm722_vm9 = vcmask (!%p1099_p11), 1040384  }
  0x70   : > { %s1399_s26 = smov (!%p1099_p11), 112   ;;  %s1400_s9 = smov (!%p1099_p11), 80   ;;  %vm724_vm10 = vcmask (!%p1099_p11), 1041408   ;;  %vm726_vm11 = vcmask (!%p1099_p11), 1042432   ;;  %vm729_vm12 = vcmask (!%p1099_p11), 1044480   ;;  %vm731_vm13 = vcmask (!%p1099_p11), 1045504  }
  0x71   : > { %s1401_s14 = smov (!%p1099_p11), 64   ;;  %s1402_s29 = smov (!%p1099_p11), 48   ;;  %vm733_vm14 = vcmask (!%p1099_p11), 1046528  }
  0x72   : > { %353 = vrot.lane.b32.xlu0 %v344_v9, %s1394_s20  ;;  %357 = vrot.lane.b32.xlu1 %v346_v10, %s1394_s20  ;;  %v399_v36 = vstv %s326_s11  ;;  %s1403_s19 = smov (!%p1099_p11), 32   ;;  %s1404_s12 = smov (!%p1099_p11), 16  }
  0x76   : > { %359 = vrot.lane.b32.xlu0 %v347_v13, %s1394_s20  ;;  %361 = vrot.lane.b32.xlu1 %v348_v14, %s1394_s20 }
  0x7a   : > { %363 = vrot.lane.b32.xlu0 %v349_v17, %s1394_s20  ;;  %365 = vrot.lane.b32.xlu1 %v350_v18, %s1394_s20 }
  0xe0   : > { %v352_v19 = vpop.permute.xlu0 %351  ;;  %v356_v20 = vpop.permute.xlu1 %355 }
  0xe1   : > { %v367_v21 = vadd.f32 %v352_v19, %v343_v5  ;;  %v369_v22 = vadd.f32 %v356_v20, %v345_v6  ;;  %v1396_v19 = vmov 0.0  }
  0xe2   : > { %601 = vmatprep.mubr.f32.mxu0 %v1396_v19 }
  0xe3   : > { %375 = vrot.lane.b32.xlu0 %v367_v21, %s1395_s8 }
  0xe4   : > { %v354_v23 = vpop.permute.xlu0 %353  ;;  %v358_v24 = vpop.permute.xlu1 %357 }
  0xe5   : > { %v368_v25 = vadd.f32 %v354_v23, %v344_v9  ;;  %v370_v26 = vadd.f32 %v358_v24, %v346_v10 }
  0xe7   : > { %379 = vrot.lane.b32.xlu0 %v369_v22, %s1395_s8  ;;  %377 = vrot.lane.b32.xlu1 %v368_v25, %s1395_s8 }
  0xe8   : > { %v360_v27 = vpop.permute.xlu0 %359  ;;  %v362_v28 = vpop.permute.xlu1 %361 }
  0xe9   : > { %v371_v29 = vadd.f32 %v360_v27, %v347_v13  ;;  %v372_v30 = vadd.f32 %v362_v28, %v348_v14  ;;  %v465_v13 = vld [vmem:[#allocation9 + $0x8] sm:$0xff]  ;;  %v467_v14 = vld [vmem:[#allocation9 + $0x18] sm:$0xff] }
  0xea   : > { %v1133_v15 = vpack.c.bf16 %v467_v14, %v465_v13 }
  0xeb   : > { %381 = vrot.lane.b32.xlu1 %v370_v26, %s1395_s8  ;;  %383 = vrot.lane.b32.xlu0 %v371_v29, %s1395_s8 }
  0xec   : > { %v364_v31 = vpop.permute.xlu0 %363  ;;  %v366_v32 = vpop.permute.xlu1 %365  ;;  %1134 = vmatprep.subr.bf16.mxu0 %v1133_v15 }
  0xed   : > { %v373_v33 = vadd.f32 %v364_v31, %v349_v17  ;;  %v374_v34 = vadd.f32 %v366_v32, %v350_v18  ;;  %v466_v17 = vld [vmem:[#allocation9 + $0x10] sm:$0xff] }
  0xee   : > { %v1135_v18 = vpack.c.bf16 %v466_v17, %v464_v16 }
  0xef   : > { %385 = vrot.lane.b32.xlu1 %v372_v30, %s1395_s8  ;;  %387 = vrot.lane.b32.xlu0 %v373_v33, %s1395_s8 }
  0xf0   : > { %1136 = vmatpush1.bf16.msra.mxu0 %v1135_v18 }
  0xf3   : > { %389 = vrot.lane.b32.xlu1 %v374_v34, %s1395_s8 }
 0x155   : > { %v376_v35 = vpop.permute.xlu0 %375 }
 0x156   : > { %v391_v37 = vadd.f32 %v376_v35, %v367_v21  ;;  %v470_v21 = vlaneseq }
 0x158   : > { %v400_v38 = vadd.f32 %v399_v36, %v391_v37  ;;  %v1627_v24 = vand.u32 127, %v470_v21  ;;  %v1631_v32 = vshrl.u32 %v470_v21, 7  ;;  %vm659_vm8 = vcmp.lt.s32.totalorder %v470_v21, 256 }
 0x159   : > { %v378_v39 = vpop.permute.xlu1 %377  ;;  %v380_v40 = vpop.permute.xlu0 %379 }
 0x15a   : > { %v408_v42 = vmax.f32 %v400_v38, 0.0  ;;  %v392_v43 = vadd.f32 %v378_v39, %v368_v25  ;;  %v393_v44 = vadd.f32 %v380_v40, %v369_v22  ;;  %v447_v25 = vstv %s1094_s16 }
 0x15c   : > { %v401_v45 = vadd.f32 %v399_v36, %v392_v43  ;;  %v402_v46 = vadd.f32 %v399_v36, %v393_v44  ;;  %v423_v47 = vmul.f32 %v1096_v41, %v408_v42  ;;  %v492_v44 = vsub.s32 %v1627_v24, %v1631_v32 }
 0x15d   : > { %v382_v48 = vpop.permute.xlu1 %381  ;;  %v384_v49 = vpop.permute.xlu0 %383 }
 0x15e   : > { %v409_v50 = vmax.f32 %v401_v45, 0.0  ;;  %v410_v51 = vmax.f32 %v402_v46, 0.0  ;;  %v394_v52 = vadd.f32 %v382_v48, %v370_v26  ;;  %v395_v53 = vadd.f32 %v384_v49, %v371_v29  ;;  %431 = vadd.xlane.f32.xlu0 %v423_v47 }
 0x15f   : > { %v494_v26 = vadd.s32 4294967288, %v1627_v24 }
 0x160   : > { %v403_v54 = vadd.f32 %v399_v36, %v394_v52  ;;  %v404_v55 = vadd.f32 %v399_v36, %v395_v53  ;;  %v424_v56 = vmul.f32 %v1096_v41, %v409_v50  ;;  %v425_v57 = vmul.f32 %v1096_v41, %v410_v51 }
 0x161   : > { %v386_v58 = vpop.permute.xlu1 %385  ;;  %v388_v59 = vpop.permute.xlu0 %387 }
 0x162   : > { %v411_v60 = vmax.f32 %v403_v54, 0.0  ;;  %v412_v61 = vmax.f32 %v404_v55, 0.0  ;;  %v396_v62 = vadd.f32 %v386_v58, %v372_v30  ;;  %v397_v63 = vadd.f32 %v388_v59, %v373_v33  ;;  %433 = vadd.xlane.f32.xlu1 %v424_v56  ;;  %435 = vadd.xlane.f32.xlu0 %v425_v57 }
 0x164   : > { %v405_v0 = vadd.f32 %v399_v36, %v396_v62  ;;  %v406_v1 = vadd.f32 %v399_v36, %v397_v63  ;;  %v427_v2 = vmul.f32 %v1096_v41, %v412_v61  ;;  %v426_v3 = vmul.f32 %v1096_v41, %v411_v60 }
 0x165   : > { %v390_v4 = vpop.permute.xlu1 %389 }
 0x166   : > { %v413_v5 = vmax.f32 %v405_v0, 0.0  ;;  %v414_v6 = vmax.f32 %v406_v1, 0.0  ;;  %v398_v7 = vadd.f32 %v390_v4, %v374_v34  ;;  %439 = vadd.xlane.f32.xlu1 %v427_v2  ;;  %437 = vadd.xlane.f32.xlu0 %v426_v3  ;;  %v472_v2 = vsub.s32 0, %v1631_v32  ;;  %v468_v3 = vld [vmem:[%s1717_s6] sm:$0x3] }
 0x167   : > { %v476_v4 = vsub.s32 1, %v1631_v32 }
 0x168   : > { %v407_v8 = vadd.f32 %v399_v36, %v398_v7  ;;  %v429_v9 = vmul.f32 %v1096_v41, %v414_v6  ;;  %v428_v10 = vmul.f32 %v1096_v41, %v413_v5  ;;  %v497_v36 = vsub.s32 %v494_v26, %v1631_v32 }
 0x169   : > { %v613_v5 = vstv %s1098_s21  ;;  %v473_v6 = vrot.slane %v468_v3, %v472_v2  ;;  %v1397_v26 = vmov 1966171168  }
 0x16a   : > { %v415_v11 = vmax.f32 %v407_v8, 0.0  ;;  %443 = vadd.xlane.f32.xlu1 %v429_v9  ;;  %441 = vadd.xlane.f32.xlu0 %v428_v10  ;;  %v614_v7 = vadd.s32 %v613_v5, %v1631_v32  ;;  %v477_v8 = vrot.slane %v468_v3, %v476_v4  ;;  %v616_v9 = vstv %s615_s18 }
 0x16c   : > { %v430_v12 = vmul.f32 %v1096_v41, %v415_v11  ;;  %vm617_vm6 = vcmp.lt.s32.totalorder %v614_v7, %v616_v9 }
 0x16e   : > { %445 = vadd.xlane.f32.xlu0 %v430_v12 }
 0x1eb   : > { %v432_v20 = vpop.xlane.xlu0 %431 }
 0x1ec   : > { %v448_v34 = vadd.f32 %v447_v25, %v432_v20 }
 0x1ee   : > { %v456_v45 = vmax.f32 %v448_v34, 0.0 }
 0x1ef   : > { %v434_v22 = vpop.xlane.xlu1 %433  ;;  %v436_v23 = vpop.xlane.xlu0 %435 }
 0x1f0   : > { %v449_v27 = vadd.f32 %v447_v25, %v434_v22  ;;  %v450_v30 = vadd.f32 %v447_v25, %v436_v23  ;;  %v493_v55 = vrot.slane %v456_v45, %v492_v44  ;;  %v668_v45 = vstv (!%p1099_p11), %s1100_s24 }
 0x1f2   : > { %v457_v37 = vmax.f32 %v449_v27, 0.0  ;;  %v458_v40 = vmax.f32 %v450_v30, 0.0  ;;  %v642_v27 = vunpack.c.l.s4 %v1397_v26 }
 0x1f3   : > { %v440_v28 = vpop.xlane.xlu1 %439  ;;  %v438_v29 = vpop.xlane.xlu0 %437 }
 0x1f4   : > { %v451_v31 = vadd.f32 %v447_v25, %v438_v29  ;;  %v452_v33 = vadd.f32 %v447_v25, %v440_v28  ;;  %v498_v48 = vrot.slane %v457_v37, %v497_v36  ;;  %v504_v50 = vrot.slane %v458_v40, %v492_v44 }
 0x1f6   : > { %v459_v35 = vmax.f32 %v451_v31, 0.0  ;;  %v460_v43 = vmax.f32 %v452_v33, 0.0  ;;  %v500_v59 = vsel %vm499_vm1, %v498_v48, %v493_v55  ;;  %v643_v33 = vunpack.c.0.s8 %v642_v27 }
 0x1f7   : > { %v444_v38 = vpop.xlane.xlu1 %443  ;;  %v442_v39 = vpop.xlane.xlu0 %441 }
 0x1f8   : > { %v454_v41 = vadd.f32 %v447_v25, %v444_v38  ;;  %v453_v42 = vadd.f32 %v447_v25, %v442_v39  ;;  %v508_v46 = vrot.slane %v459_v35, %v497_v36  ;;  %v513_v54 = vrot.slane %v460_v43, %v492_v44 }
 0x1f9   : > { %v646_v38 = vsub.s32 %v643_v33, %v1631_v32 }
 0x1fa   : > { %v461_v47 = vmax.f32 %v453_v42, 0.0  ;;  %v462_v51 = vmax.f32 %v454_v41, 0.0  ;;  %v509_v56 = vsel %vm499_vm1, %v508_v46, %v504_v50  ;;  %v622_v41 = vld [vmem:[#allocation2] sm:$0x3] }
 0x1fb   : > { %v446_v49 = vpop.xlane.xlu0 %445  ;;  %v529_v62 = vsel %vm528_vm2, %v509_v56, %v500_v59 }
 0x1fc   : > { %v517_v52 = vrot.slane %v461_v47, %v497_v36  ;;  %v455_v53 = vadd.f32 %v447_v25, %v446_v49  ;;  %v522_v60 = vrot.slane %v462_v51, %v492_v44 }
 0x1fe   : > { %v463_v57 = vmax.f32 %v455_v53, 0.0  ;;  %v518_v58 = vsel %vm499_vm1, %v517_v52, %v513_v54 }
 0x1ff   : > { %v531_v0 = vsel %vm530_vm3, %v518_v58, %v529_v62 }
 0x200   : > { %v526_v61 = vrot.slane %v463_v57, %v497_v36 }
 0x202   : > { %v527_v63 = vsel %vm499_vm1, %v526_v61, %v522_v60 }
 0x203   : > { %v533_v1 = vsel %vm532_vm4, %v527_v63, %v531_v0  ;;  %vm781_vm4 = vcmp.eq.s32.totalorder (!%p1099_p11), %v1631_v32, %v1627_v24 }
 0x204   : > { %1097 = vmatmul.mubr.msk.f32.vlgmr.msra.gmra.mrb[0].mxu0 %vm534_vm5, %v533_v1 }
 0x2d7   : > { %v603_v10 = vpop.f32.mrb[0].mxu0 }
 0x2d8   : > { %v604_v11 = vadd.f32 %v603_v10, %v473_v6  ;;  %v605_v12 = vpop.f32.mrb[1].mxu0 }
 0x2d9   : > { %v606_v13 = vadd.f32 %v605_v12, %v477_v8 }
 0x2da   : > { %v608_v14 = vmax.f32 %v604_v11, 0.0 }
 0x2db   : > { %v609_v15 = vmax.f32 %v606_v13, 0.0 }
 0x2dc   : > { %v620_v16 = vsel %vm617_vm6, %v608_v14, 0.0  ;;  %v1405_v14 = vmov (!%p1099_p11), 0.0  }
 0x2dd   : > { %v624_v17 = vsel %vm623_vm7, %v620_v16, 0.0  ;;  %v621_v18 = vsel %vm617_vm6, %v609_v15, 0.0  ;;  %988 = vst.msk [vmem:[#allocation11] sm:$0xff] (!%p1099_p11), %vm534_vm5, %v1405_v14  ;;  %989 = vst.msk [vmem:[#allocation11 + $0x8] sm:$0xff] (!%p1099_p11), %vm534_vm5, %v1405_v14 }
 0x2de   : > { %v625_v19 = vrot.slane %v624_v17, 4  ;;  %v631_v20 = vsel %vm623_vm7, %v621_v18, 0.0 }
 0x2df   : > { %v632_v22 = vrot.slane %v631_v20, 4 }
 0x2e0   : > { %v626_v23 = vadd.f32 %v625_v19, %v624_v17 }
 0x2e1   : > { %v633_v25 = vadd.f32 %v632_v22, %v631_v20 }
 0x2e2   : > { %v627_v28 = vrot.slane %v626_v23, 2 }
 0x2e3   : > { %v634_v29 = vrot.slane %v633_v25, 2 }
 0x2e4   : > { %v628_v30 = vadd.f32 %v627_v28, %v626_v23 }
 0x2e5   : > { %v635_v31 = vadd.f32 %v634_v29, %v633_v25 }
 0x2e6   : > { %v629_v34 = vrot.slane %v628_v30, 1 }
 0x2e7   : > { %v636_v35 = vrot.slane %v635_v31, 1 }
 0x2e8   : > { %v630_v36 = vadd.f32 %v629_v34, %v628_v30 }
 0x2e9   : > { %v637_v37 = vadd.f32 %v636_v35, %v635_v31  ;;  %v780_v31 = vadd.s32 (!%p1099_p11), 8, %v1631_v32 }
 0x2eb   : > { %v640_v39 = vcombine.low %v630_v36, %v637_v37  ;;  %vm782_vm3 = vcmp.eq.s32.totalorder (!%p1099_p11), %v780_v31, %v1627_v24 }
 0x2ed   : > { %v647_v40 = vrot.slane %v640_v39, %v646_v38  ;;  %665 = sbr.rel (%p1099_p11) target bundleno = 1542 (0x606), region = 68 }
 0x2ef   : > { %v654_v42 = vrot.slane %v647_v40, %v646_v38 }
 0x2f1   : > { %v656_v43 = vadd.f32 %v654_v42, %v622_v41 }
 0x2f3   : > { %661 = vst.msk [vmem:[#allocation2] sm:$0x3] %vm659_vm8, %v656_v43 }
 0x2fa   : > { %v666_v44 = vld [vmem:[#allocation2] sm:$0x3] }
 0x2fb   : > { %v669_v46 = vmul.f32 %v668_v45, %v666_v44 }
 0x2fd   : > { %v674_v47 = vrot.slane %v669_v46, %v472_v2  ;;  %v699_v48 = vrot.slane %v669_v46, %v476_v4 }
 0x2ff   : > { %678 = vrot.lane.b32.xlu1 %v674_v47, %s1398_s25  ;;  %675 = vrot.lane.b32.xlu0 %v674_v47, %s1399_s26 }
 0x303   : > { %704 = vrot.lane.b32.xlu1 %v699_v48, %s1398_s25  ;;  %701 = vrot.lane.b32.xlu0 %v699_v48, %s1399_s26 }
 0x307   : > { %707 = vrot.lane.b32.xlu1 %v699_v48, %s1400_s9  ;;  %681 = vrot.lane.b32.xlu0 %v674_v47, %s1400_s9 }
 0x30b   : > { %710 = vrot.lane.b32.xlu1 %v699_v48, %s1401_s14  ;;  %684 = vrot.lane.b32.xlu0 %v674_v47, %s1401_s14 }
 0x30f   : > { %713 = vrot.lane.b32.xlu1 %v699_v48, %s1402_s29  ;;  %687 = vrot.lane.b32.xlu0 %v674_v47, %s1402_s29 }
 0x313   : > { %716 = vrot.lane.b32.xlu1 %v699_v48, %s1403_s19  ;;  %690 = vrot.lane.b32.xlu0 %v674_v47, %s1403_s19 }
 0x317   : > { %719 = vrot.lane.b32.xlu1 %v699_v48, %s1404_s12  ;;  %693 = vrot.lane.b32.xlu0 %v674_v47, %s1404_s12 }
 0x371   : > { %v679_v21 = vpop.permute.xlu1 %678  ;;  %v676_v49 = vpop.permute.xlu0 %675 }
 0x372   : > { %v723_v58 = vsel %vm722_vm9, %v669_v46, %v676_v49 }
 0x373   : > { %v725_v61 = vsel %vm724_vm10, %v723_v58, %v679_v21 }
 0x375   : > { %v705_v50 = vpop.permute.xlu1 %704  ;;  %v702_v51 = vpop.permute.xlu0 %701 }
 0x376   : > { %v735_v59 = vsel %vm722_vm9, %v699_v48, %v702_v51 }
 0x377   : > { %v736_v60 = vsel %vm724_vm10, %v735_v59, %v705_v50 }
 0x379   : > { %v708_v52 = vpop.permute.xlu1 %707  ;;  %v682_v53 = vpop.permute.xlu0 %681 }
 0x37a   : > { %v737_v0 = vsel %vm726_vm11, %v736_v60, %v708_v52  ;;  %v727_v1 = vsel %vm726_vm11, %v725_v61, %v682_v53 }
 0x37d   : > { %v711_v54 = vpop.permute.xlu1 %710  ;;  %v685_v55 = vpop.permute.xlu0 %684 }
 0x37e   : > { %v738_v2 = vsel %vm623_vm7, %v737_v0, %v711_v54  ;;  %v728_v3 = vsel %vm623_vm7, %v727_v1, %v685_v55 }
 0x381   : > { %v714_v56 = vpop.permute.xlu1 %713  ;;  %v688_v57 = vpop.permute.xlu0 %687 }
 0x382   : > { %v739_v4 = vsel %vm729_vm12, %v738_v2, %v714_v56  ;;  %v730_v5 = vsel %vm729_vm12, %v728_v3, %v688_v57 }
 0x385   : > { %v717_v62 = vpop.permute.xlu1 %716  ;;  %v691_v63 = vpop.permute.xlu0 %690 }
 0x386   : > { %v740_v6 = vsel %vm731_vm13, %v739_v4, %v717_v62  ;;  %v732_v7 = vsel %vm731_vm13, %v730_v5, %v691_v63 }
 0x389   : > { %v720_v8 = vpop.permute.xlu1 %719  ;;  %v694_v9 = vpop.permute.xlu0 %693 }
 0x38a   : > { %v741_v10 = vsel %vm733_vm14, %v740_v6, %v720_v8  ;;  %v734_v11 = vsel %vm733_vm14, %v732_v7, %v694_v9 }
 0x38b   : > { %v777_v12 = vsel %vm534_vm5, %v741_v10, 0.0  ;;  %v774_v13 = vsel %vm534_vm5, %v734_v11, 0.0 }
 0x38c   : > { %778 = vadd.xlane.f32.xlu1 %v777_v12  ;;  %775 = vadd.xlane.f32.xlu0 %v774_v13 }
 0x3b9   : > { %742 = vxpose.xlu0.b32.start [1/2] (short) (narrow) %v734_v11, 16 }
 0x3bd   : > { %743 = vxpose.xlu0.b32.end [2/2] (short) (narrow) %v741_v10, 16 }
 0x419   : > { %v779_v15 = vpop.xlane.xlu1 %778  ;;  %v776_v16 = vpop.xlane.xlu0 %775 }
 0x41a   : > { %1231 = vrsqrt.f32 %v779_v15  ;;  %vm794_vm15 = vcmp.eq.f32.partialorder %v779_v15, inf  ;;  %v797_v20 = vand.u32 2147483648, %v779_v15  ;;  %vm796_vm0 = vcmp.eq.f32.partialorder %v779_v15, 0.0 }
 0x41b   : > { %1233 = vrsqrt.f32 %v776_v16  ;;  %vm787_vm1 = vcmp.eq.f32.partialorder %v776_v16, inf  ;;  %v790_v25 = vand.u32 2147483648, %v776_v16  ;;  %vm789_vm2 = vcmp.eq.f32.partialorder %v776_v16, 0.0 }
 0x41c   : > { %v783_v48 = vsel %vm781_vm4, %v776_v16, 0.0  ;;  %v784_v49 = vsel %vm782_vm3, %v779_v15, 0.0 }
 0x424   : > { %v1232_v17 = vpop.eup %1231 }
 0x425   : > { %v1234_v18 = vpop.eup %1233  ;;  %v793_v19 = vmul.f32 %v1232_v17, %v779_v15 }
 0x426   : > { %v786_v22 = vmul.f32 %v1234_v18, %v776_v16 }
 0x427   : > { %v795_v23 = vsel %vm794_vm15, %v779_v15, %v793_v19 }
 0x428   : > { %v798_v26 = vsel %vm796_vm0, %v797_v20, %v795_v23  ;;  %v788_v27 = vsel %vm787_vm1, %v776_v16, %v786_v22 }
 0x429   : > { %v800_v28 = vadd.f32 1e-07, %v798_v26  ;;  %v791_v29 = vsel %vm789_vm2, %v790_v25, %v788_v27 }
 0x42a   : > { %v799_v30 = vadd.f32 1e-07, %v791_v29 }
 0x42b   : > { %1235 = vrcp.f32 %v800_v28 }
 0x42c   : > { %1237 = vrcp.f32 %v799_v30 }
 0x435   : > { %v1236_v33 = vpop.eup %1235 }
 0x436   : > { %v1238_v34 = vpop.eup %1237  ;;  %v806_v35 = vsel %vm782_vm3, %v1236_v33, 0.0 }
 0x437   : > { %v805_v36 = vsel %vm781_vm4, %v1238_v34, 0.0  ;;  %v808_v37 = vsel %vm534_vm5, %v806_v35, 0.0 }
 0x438   : > { %v807_v38 = vsel %vm534_vm5, %v805_v36, 0.0 }
 0x439   : > { %v758_v39 = vpop.trf.xlu0  ;;  %v809_v40 = vadd.f32 %v808_v37, %v807_v38 }
 0x43a   : > { %v816_v41 = vadd.f32 %v758_v39, %v734_v11 }
 0x43b   : > { %v810_v42 = vrot.slane %v809_v40, 4 }
 0x43c   : > { %v818_v43 = vmul.f32 0.5, %v816_v41 }
 0x43d   : > { %v811_v44 = vadd.f32 %v810_v42, %v809_v40  ;;  %v759_v45 = vpop.trf.xlu0 }
 0x43e   : > { %v817_v46 = vadd.f32 %v759_v45, %v741_v10  ;;  %v820_v32 = vsub.f32 %v783_v48, %v818_v43 }
 0x43f   : > { %v812_v47 = vrot.slane %v811_v44, 2 }
 0x440   : > { %v819_v21 = vmul.f32 0.5, %v817_v46  ;;  %v822_v54 = vmul.f32 %v1238_v34, %v820_v32 }
 0x441   : > { %v813_v50 = vadd.f32 %v812_v47, %v811_v44 }
 0x442   : > { %v821_v51 = vsub.f32 %v784_v49, %v819_v21 }
 0x443   : > { %v814_v52 = vrot.slane %v813_v50, 1 }
 0x444   : > { %v823_v53 = vmul.f32 %v1236_v33, %v821_v51 }
 0x445   : > { %v815_v55 = vadd.f32 %v814_v52, %v813_v50 }
 0x447   : > { %v825_v56 = vmul.f32 %v823_v53, %v815_v55  ;;  %v824_v57 = vmul.f32 %v822_v54, %v815_v55 }
 0x449   : > { %992 = vst.msk [vmem:[#allocation11 + $0x18] sm:$0xff] %vm534_vm5, %v825_v56  ;;  %1123 = vmatprep.mubr.msk.f32.mxu0 %vm534_vm5, %v824_v57  ;;  %991 = vst.msk [vmem:[#allocation11 + $0x10] sm:$0xff] %vm534_vm5, %v824_v57  ;;  %1130 = vmatprep.mubr.msk.f32.mxu1 %vm534_vm5, %v824_v57  ;;  %v1137_v58 = vpack.c.bf16 %v825_v56, %v824_v57 }
 0x44b   : > { %1138 = vmatprep.subr.bf16.mxu0 %v1137_v58 }
 0x44c   : > { %1140 = vmatpush3.bf16.msra.mxu0 %v1137_v58 }
 0x44f   : > { %1124 = vmatmul.mubr.msk.f32.vlgmr.msra.gmra.mrb[0].mxu0 %vm534_vm5, %v825_v56 }
 0x522   : > { %v1125_v24 = vpop.f32.mrb[0].mxu0 }
 0x523   : > { %v908_v59 = vmul.f32 2.0, %v1125_v24  ;;  %v898_v60 = vpop.f32.mrb[1].mxu0 }
 0x524   : > { %v907_v61 = vmul.f32 2.0, %v898_v60 }
 0x525   : > { %995 = vst.msk [vmem:[#allocation11 + $0x28] sm:$0xff] %vm534_vm5, %v908_v59 }
 0x526   : > { %994 = vst.msk [vmem:[#allocation11 + $0x20] sm:$0xff] %vm534_vm5, %v907_v61  ;;  %v1141_v62 = vpack.c.bf16 %v908_v59, %v907_v61 }
 0x528   : > { %1142 = vmatprep.subr.bf16.mxu1 %v1141_v62 }
 0x529   : > { %1144 = vmatpush3.bf16.msra.mxu1 %v1141_v62 }
 0x52c   : > { %1131 = vmatmul.mubr.msk.f32.vlgmr.msra.gmra.mrb[0].mxu1 %vm534_vm5, %v825_v56 }
 0x5ff   : > { %v1132_v63 = vpop.f32.mrb[0].mxu1 }
 0x600   : > { %v985_v0 = vmul.f32 2.0, %v1132_v63  ;;  %v975_v1 = vpop.f32.mrb[1].mxu1 }
 0x601   : > { %v984_v2 = vmul.f32 2.0, %v975_v1 }
 0x602   : > { %v987_v3 = vsub.f32 %v985_v0, %v825_v56 }
 0x603   : > { %v986_v4 = vsub.f32 %v984_v2, %v824_v57 }
 0x604   : > { %998 = vst.msk [vmem:[#allocation11 + $0x38] sm:$0xff] %vm534_vm5, %v987_v3 }
 0x605   : > { %997 = vst.msk [vmem:[#allocation11 + $0x30] sm:$0xff] %vm534_vm5, %v986_v4 }
 0x606 PF: > { %p1175_p4 = scmp.eq.s32.totalorder %s1471_s1, 1  ;;  %s1406_s13 = smov [#allocation11]  }
 0x607   : > { %s1005_s20 = sshll.u32 %s1406_s13, 4  ;;  %s1006_s20 = int_to_ptr.vmem [resolvable:$true] %s1005_s20 }
 0x608   : > { %s1312_s8 = scalar_lea.vmem %s1006_s20, 1024  ;;  %p1319_p5 = scmp.lt.s32.totalorder %s1006_s20, %s1006_s20 }
 0x609   : > { %p1313_p12 = scmp.ne.s32.totalorder %s1006_s20, %s1312_s8  ;;  %p1320_p9 = scmp.lt.s32.totalorder %s1312_s8, %s1312_s8 }
 0x60b   : > { %p1314_p8 = pnand %p1313_p12, %p1175_p4  ;;  %p1321_p3 = por %p1320_p9, %p1319_p5 }
 0x60d   : > { %p1315_p2 = pneg %p1314_p8 }
 0x60f   : > { %p1322_p13 = pnand %p1321_p3, %p1315_p2 }
 0x611   : > { %1325 = shalt.err (!%p1322_p13)
}
 0x612   : > { %s1326_s15 = scalar_lea.hbm %s1718_s7, 1024 }
 0x613   : > { %p1327_p1 = scmp.ne.s32.totalorder %s1718_s7, %s1326_s15  ;;  %p1332_p0 = scmp.lt.u32.totalorder %s1326_s15, %s1718_s7 }
 0x615   : > { %p1328_p6 = pnand %p1327_p1, %p1175_p4 }
 0x617   : > { %p1329_p10 = pneg %p1328_p6 }
 0x619   : > { %p1334_p7 = pnand %p1332_p0, %p1329_p10 }
 0x61b   : > { %1337 = shalt.err (!%p1334_p7)
}
 0x61c   : > { %s1407_s23 = smov 128   ;;  %s1408_s24 = smov 8  }
 0x61d   : > { %1156 = dma.vmem_to_hbm [thread:$0]  (%p1175_p4), %s1006_s20, 1024, %s1718_s7, [#allocation6], %s1407_s23, %s1407_s23, %s1408_s24  }
 0x61e   : > { %1367 = dma.done.wait (%p1175_p4), [#allocation6], 1024  }
 0x61f   : > { %1369 = vsyncadd (%p1175_p4), [#allocation6], 4294966272 }
 0x620 PF: > { %p21_p11 = scmp.ge.s32.totalorder %s1474_s30, 4   ;;  %s1732_s26 = smov %s1376_s27 }
 0x621   : > { %s1733_s27 = smov %s1380_s28  ;;  %s1734_s28 = smov %s1484_s10 }
 0x622   : > { %s1735_s29 = smov %s1474_s30  ;;  %23 = sbr.rel (!%p21_p11) target bundleno = 8 (0x8), region = 105 }
 0x629   :  { %1021 = vsyncpa [#allocation5], 1 }
 0x62a   :  { %1023 = vsyncpa [#allocation5 + $0x1], 1 }
 0x62b   :  { %1024 = vsyncpa [#allocation10], 1 }
 0x62c   :  { %1025 = vsyncpa [#allocation6], 1 }
 0x62d   :  { %1027 = vsyncpa [#allocation6 + $0x1], 1 }
 0x62e   :  { %1028 = vsyncpa [#allocation7], 1 }
 0x62f   :  { %1030 = vsyncpa [#allocation7 + $0x1], 1 }

</bundles_post_ra>
